<compile_context>
chip_gen: v7x
topology: tpu7x:2x2x1
jax: 0.10.0
libtpu: 0.0.40
codegen_flags: <defaults>
</compile_context>

<pallas_src>
import jax
import jax.numpy as jnp
from jax.experimental import pallas as pl
from jax.experimental.pallas import tpu as pltpu


# ----------------------------------------------------------------------------- kernels

def _cat_kernel(g_ref, h_ref, o_ref):
    # Output presented as (tile_n, 2, C): both stores are lane-dense even when
    # C % 128 != 0 (no masked vst at lane offset C). Wrapper reshapes to (N, 2C).
    o_ref[:, 0, :] = g_ref[...]
    o_ref[:, 1, :] = h_ref[...]


def _weighted_kernel(w_ref, g_ref, h_ref, o_ref):
    # SMEM scalar reads hoisted out of the vector expression.
    w_g = w_ref[0]
    w_h = w_ref[1]
    o_ref[...] = (w_g * g_ref[...].astype(jnp.float32)
                  + w_h * h_ref[...].astype(jnp.float32)).astype(o_ref.dtype)


def _attention_kernel(g_ref, h_ref, awg_ref, awh_ref, o_ref):
    # Score = sigmoid(<[g,h], attn_w>) as VPU multiply + lane reduce in f32.
    # (An [N,2C]@[2C,1] MXU matmul would use <1% of the MXU lanes.)
    g = g_ref[...].astype(jnp.float32)
    h = h_ref[...].astype(jnp.float32)
    s = jnp.sum(g * awg_ref[...] + h * awh_ref[...], axis=-1, keepdims=True)
    scores = jax.nn.sigmoid(s)
    o_ref[...] = (h + scores * (g - h)).astype(o_ref.dtype)      # 3 VALU ops


def _mlp_kernel(g_ref, h_ref, w1g_ref, w1h_ref, b1_ref, w2_ref, b2_ref, o_ref):
    # concat([g,h]) @ W1 == g @ W1[:C] + h @ W1[C:]  -> no [N,2C] temp.
    # bf16 MXU operands, f32 accumulation (preferred_element_type).
    g = g_ref[...].astype(jnp.bfloat16)
    h = h_ref[...].astype(jnp.bfloat16)
    hidden = jnp.maximum(
        jnp.dot(g, w1g_ref[...], preferred_element_type=jnp.float32)
        + jnp.dot(h, w1h_ref[...], preferred_element_type=jnp.float32)
        + b1_ref[...], 0.0)
    out = (jnp.dot(hidden.astype(jnp.bfloat16), w2_ref[...],
                   preferred_element_type=jnp.float32) + b2_ref[...])
    o_ref[...] = out.astype(o_ref.dtype)


def _gated_kernel(g_ref, h_ref, wgg_ref, wgh_ref, bg_ref, o_ref):
    g = g_ref[...]
    h = h_ref[...]
    gate = jax.nn.sigmoid(
        jnp.dot(g.astype(jnp.bfloat16), wgg_ref[...],
                preferred_element_type=jnp.float32)
        + jnp.dot(h.astype(jnp.bfloat16), wgh_ref[...],
                  preferred_element_type=jnp.float32)
        + bg_ref[...])
    gf = g.astype(jnp.float32)
    hf = h.astype(jnp.float32)
    o_ref[...] = (hf + gate * (gf - hf)).astype(o_ref.dtype)     # 3 VALU ops


# ----------------------------------------------------------------------------- VMEM budgeting

def _vmem_budgets():
    """(per-step working-set budget, Mosaic vmem_limit_bytes), per TPU generation."""
    conservative = (20 * 1024 * 1024, 44 * 1024 * 1024)   # v7x: 64 MiB VMEM per TC
    try:
        cap = pltpu.get_tpu_info().vmem_capacity_bytes
    except Exception:
        return conservative                               # unknown -> safest choice
    if cap <= 64 * 1024 * 1024:
        return conservative
    return (56 * 1024 * 1024, 100 * 1024 * 1024)          # v5e / v6e: 128 MiB VMEM


def _round_up(x, m):
    return ((x + m - 1) // m) * m


def _choose_tile_n(N, row_bytes, resident_bytes, budget):
    """Largest row tile whose double-buffered per-row working set, plus the
    single-buffered resident weights, fits the per-generation VMEM budget."""
    avail = budget - resident_bytes
    min_ws = 2 * row_bytes * 8
    if avail < min_ws:
        avail = min_ws                       # never go below 8-row tiles
    tile = avail // (2 * row_bytes)          # x2: double-buffered row tiles
    # Keep >=2 grid steps on large N so dimension_semantics=("parallel",) can
    # shard across v7x's two TensorCores and DMA/compute overlap survives.
    if N >= 256:
        tile = min(tile, _round_up(pl.cdiv(N, 2), 128))
    if tile >= N:
        return N                             # full-dim block
    if tile >= 128:
        return (tile // 128) * 128           # lane/MXU-friendly multiples of 128
    return max(8, (tile // 8) * 8)


def _nbytes(*arrs):
    return sum(int(a.size) * a.dtype.itemsize for a in arrs)


# ----------------------------------------------------------------------------- spec helpers

def _row_spec(tile_n, *feat_dims):
    nd_feat = len(feat_dims)
    return pl.BlockSpec((tile_n,) + tuple(feat_dims),
                        lambda i: (i,) + (0,) * nd_feat)


def _resident_spec(arr):
    # Constant index map -> block stays VMEM-resident across the pipeline;
    # Buffered(1) avoids allocating a pointless second buffer for weights.
    nd = arr.ndim
    return pl.BlockSpec(arr.shape, lambda i: (0,) * nd,
                        pipeline_mode=pl.Buffered(buffer_count=1))


def _compiler_params(vmem_limit_bytes):
    return pltpu.CompilerParams(
        dimension_semantics=("parallel",),        # shard the N grid across TCs
        vmem_limit_bytes=vmem_limit_bytes,
    )


# ----------------------------------------------------------------------------- parameter init
# PyTorch nn.Linear default init: U(-1/sqrt(fan_in), 1/sqrt(fan_in)) for W and b.
# xavier_uniform(gain) for attention_weights: U(-a, a), a = gain*sqrt(6/(fan_in+fan_out)).

def _linear_params(key, fan_in, fan_out, w_dtype):
    kw, kb = jax.random.split(key)
    bound = 1.0 / jnp.sqrt(fan_in)
    # stored pre-transposed: [fan_in, fan_out]
    w = jax.random.uniform(kw, (fan_in, fan_out), jnp.float32, -bound, bound)
    b = jax.random.uniform(kb, (1, fan_out), jnp.float32, -bound, bound)
    return w.astype(w_dtype), b                  # bias stays f32 (added post-MXU)


def init_fusion_params(key, in_channels, fusion_type):
    C = in_channels
    if fusion_type == "cat":
        return {}
    if fusion_type == "weighted":
        return {"w": jnp.array([0.2, 0.8], dtype=jnp.float32)}
    if fusion_type == "attention":
        # NOTE: AttentionFusion.fc exists in the PyTorch module but is unused in forward.
        gain = 1.414
        a = gain * jnp.sqrt(6.0 / (2 * C + 1))
        aw = jax.random.uniform(key, (2 * C,), jnp.float32, -a, a)
        return {"aw_g": aw[:C].reshape(1, C), "aw_h": aw[C:].reshape(1, C)}
    if fusion_type == "mlp":
        k1, k2 = jax.random.split(key)
        w1, b1 = _linear_params(k1, 2 * C, C, jnp.bfloat16)   # bf16 MXU operands
        w2, b2 = _linear_params(k2, C, C, jnp.bfloat16)
        return {"w1_g": w1[:C], "w1_h": w1[C:], "b1": b1, "w2": w2, "b2": b2}
    if fusion_type == "gated":
        wg, bg = _linear_params(key, 2 * C, C, jnp.bfloat16)
        return {"wg_g": wg[:C], "wg_h": wg[C:], "bg": bg}
    raise ValueError(f"Unknown fusion type: {fusion_type}")


# ----------------------------------------------------------------------------- wrapper

class FusionLayer:
    def __init__(self, in_channels, fusion_type, key):
        self.in_channels = in_channels
        self.fusion_type = fusion_type
        self.params = init_fusion_params(key, in_channels, fusion_type)

    def __call__(self, g_embed, h_embed):
        N, C = g_embed.shape
        esz = g_embed.dtype.itemsize
        p = self.params
        ft = self.fusion_type
        budget, vmem_limit = _vmem_budgets()
        cp = _compiler_params(vmem_limit)

        if ft == "cat":
            tile_n = _choose_tile_n(N, 4 * C * esz, 0, budget)    # g + h + 2C out
            out = pl.pallas_call(
                _cat_kernel,
                out_shape=jax.ShapeDtypeStruct((N, 2, C), g_embed.dtype),
                grid=(pl.cdiv(N, tile_n),),
                in_specs=[_row_spec(tile_n, C), _row_spec(tile_n, C)],
                out_specs=_row_spec(tile_n, 2, C),
                compiler_params=cp,
                cost_estimate=pl.CostEstimate(
                    flops=0, transcendentals=0,
                    bytes_accessed=4 * N * C * esz),
            )(g_embed, h_embed)
            return out.reshape(N, 2 * C)          # free layout change

        if ft == "weighted":
            tile_n = _choose_tile_n(N, 3 * C * esz, 0, budget)
            w_spec = pl.BlockSpec(memory_space=pltpu.MemorySpace.SMEM)
            return pl.pallas_call(
                _weighted_kernel,
                out_shape=jax.ShapeDtypeStruct((N, C), g_embed.dtype),
                grid=(pl.cdiv(N, tile_n),),
                in_specs=[w_spec, _row_spec(tile_n, C), _row_spec(tile_n, C)],
                out_specs=_row_spec(tile_n, C),
                compiler_params=cp,
                cost_estimate=pl.CostEstimate(
                    flops=3 * N * C, transcendentals=0,
                    bytes_accessed=3 * N * C * esz),
            )(p["w"], g_embed, h_embed)

        if ft == "attention":
            resident = _nbytes(p["aw_g"], p["aw_h"])
            row_bytes = 3 * C * esz + 2 * C * 4       # + f32 promoted g/h temps
            tile_n = _choose_tile_n(N, row_bytes, resident, budget)
            return pl.pallas_call(
                _attention_kernel,
                out_shape=jax.ShapeDtypeStruct((N, C), g_embed.dtype),
                grid=(pl.cdiv(N, tile_n),),
                in_specs=[_row_spec(tile_n, C), _row_spec(tile_n, C),
                          _resident_spec(p["aw_g"]), _resident_spec(p["aw_h"])],
                out_specs=_row_spec(tile_n, C),
                compiler_params=cp,
                cost_estimate=pl.CostEstimate(
                    flops=8 * N * C, transcendentals=N,
                    bytes_accessed=3 * N * C * esz + resident),
            )(g_embed, h_embed, p["aw_g"], p["aw_h"])

        if ft == "mlp":
            resident = _nbytes(p["w1_g"], p["w1_h"], p["w2"], p["b1"], p["b2"])
            # g + h + out rows (input dtype) + bf16 operand copies + f32 hidden/acc.
            row_bytes = 3 * C * esz + 2 * C * 2 + 2 * C * 4
            tile_n = _choose_tile_n(N, row_bytes, resident, budget)
            return pl.pallas_call(
                _mlp_kernel,
                out_shape=jax.ShapeDtypeStruct((N, C), g_embed.dtype),
                grid=(pl.cdiv(N, tile_n),),
                in_specs=[_row_spec(tile_n, C), _row_spec(tile_n, C),
                          _resident_spec(p["w1_g"]), _resident_spec(p["w1_h"]),
                          _resident_spec(p["b1"]),
                          _resident_spec(p["w2"]), _resident_spec(p["b2"])],
                out_specs=_row_spec(tile_n, C),
                compiler_params=cp,
                cost_estimate=pl.CostEstimate(
                    flops=6 * N * C * C, transcendentals=0,
                    bytes_accessed=3 * N * C * esz + resident),
            )(g_embed, h_embed, p["w1_g"], p["w1_h"], p["b1"], p["w2"], p["b2"])

        if ft == "gated":
            resident = _nbytes(p["wg_g"], p["wg_h"], p["bg"])
            row_bytes = 3 * C * esz + 2 * C * 2 + 2 * C * 4
            tile_n = _choose_tile_n(N, row_bytes, resident, budget)
            return pl.pallas_call(
                _gated_kernel,
                out_shape=jax.ShapeDtypeStruct((N, C), g_embed.dtype),
                grid=(pl.cdiv(N, tile_n),),
                in_specs=[_row_spec(tile_n, C), _row_spec(tile_n, C),
                          _resident_spec(p["wg_g"]), _resident_spec(p["wg_h"]),
                          _resident_spec(p["bg"])],
                out_specs=_row_spec(tile_n, C),
                compiler_params=cp,
                cost_estimate=pl.CostEstimate(
                    flops=4 * N * C * C + 6 * N * C, transcendentals=N * C,
                    bytes_accessed=3 * N * C * esz + resident),
            )(g_embed, h_embed, p["wg_g"], p["wg_h"], p["bg"])

        raise ValueError(f"Unknown fusion type: {ft}")


# ----------------------------------------------------------------------------- plain-JAX references
# mlp/gated references use the same bf16-operand / f32-accumulation math as the
# kernels (the documented perf tradeoff vs the pure-f32 PyTorch weights).

def _ref_forward(layer, g, h):
    p = layer.params
    ft = layer.fusion_type
    if ft == "cat":
        return jnp.concatenate([g, h], axis=-1)
    if ft == "weighted":
        return p["w"][0] * g + p["w"][1] * h
    if ft == "attention":
        s = jax.nn.sigmoid(
            jnp.sum(g * p["aw_g"] + h * p["aw_h"], axis=-1, keepdims=True))
        return h + s * (g - h)
    if ft == "mlp":
        gb = g.astype(jnp.bfloat16)
        hb = h.astype(jnp.bfloat16)
        hid = jax.nn.relu(
            jnp.dot(gb, p["w1_g"], preferred_element_type=jnp.float32)
            + jnp.dot(hb, p["w1_h"], preferred_element_type=jnp.float32)
            + p["b1"])
        out = (jnp.dot(hid.astype(jnp.bfloat16), p["w2"],
                       preferred_element_type=jnp.float32) + p["b2"])
        return out.astype(g.dtype)
    if ft == "gated":
        gate = jax.nn.sigmoid(
            jnp.dot(g.astype(jnp.bfloat16), p["wg_g"],
                    preferred_element_type=jnp.float32)
            + jnp.dot(h.astype(jnp.bfloat16), p["wg_h"],
                      preferred_element_type=jnp.float32)
            + p["bg"])
        return (h + gate * (g - h)).astype(g.dtype)


# ----------------------------------------------------------------------------- main

if __name__ == "__main__":
    N, C = 8, 32   # small shapes; tiling/grid kicks in automatically at large N
    key = jax.random.PRNGKey(0)
    kg, kh, kp = jax.random.split(key, 3)
    g_embed = jax.random.normal(kg, (N, C), jnp.float32)
    h_embed = jax.random.normal(kh, (N, C), jnp.float32)

    tolerances = {"cat": 1e-5, "weighted": 1e-5, "attention": 1e-5,
                  "mlp": 1e-2, "gated": 1e-2}

    ok = True
    for i, ft in enumerate(["cat", "weighted", "attention", "mlp", "gated"]):
        layer = FusionLayer(C, ft, jax.random.fold_in(kp, i))
        out = jax.block_until_ready(layer(g_embed, h_embed))
        ref = _ref_forward(layer, g_embed, h_embed)
        tol = tolerances[ft]
        if not jnp.allclose(out, ref, atol=tol, rtol=tol):
            ok = False
            print(f"MISMATCH in fusion_type={ft}")

    if ok:
        print("KERNEL_OK")
</pallas_src>

<mosaic_0001>
module attributes {stable_mosaic.version = 11 : i64} {
  func.func @_cat_kernel(%arg0: i32, %arg1: memref<8x32xf32, #tpu.memory_space<vmem>>, %arg2: memref<8x32xf32, #tpu.memory_space<vmem>>, %arg3: memref<8x2x32xf32, #tpu.memory_space<vmem>>) attributes {dimension_semantics = [#tpu.dimension_semantics<parallel>], iteration_bounds = array<i64: 1>, scalar_prefetch = 0 : i64, scratch_operands = 0 : i64, tpu.core_type = #tpu.core_type<tc>, window_params = [{transform_indices = @transform_0, window_bounds = array<i64: 8, 32>}, {transform_indices = @transform_1, window_bounds = array<i64: 8, 32>}, {transform_indices = @transform_2, window_bounds = array<i64: 8, 2, 32>}]} {
    %c0 = arith.constant 0 : index
    %c0_0 = arith.constant 0 : index
    %0 = vector.load %arg1[%c0, %c0_0] : memref<8x32xf32, #tpu.memory_space<vmem>>, vector<8x32xf32>
    %c0_1 = arith.constant 0 : index
    %c0_2 = arith.constant 0 : index
    %c0_3 = arith.constant 0 : index
    %1 = vector.load %arg3[%c0_1, %c0_2, %c0_3] : memref<8x2x32xf32, #tpu.memory_space<vmem>>, vector<8x1x32xf32>
    %2 = vector.shape_cast %1 : vector<8x1x32xf32> to vector<8x32xf32>
    %3 = vector.shape_cast %0 : vector<8x32xf32> to vector<8x1x32xf32>
    tpu.vector_store %arg3[%c0_1, %c0_2, %c0_3], %3 {strides = array<i32>} : memref<8x2x32xf32, #tpu.memory_space<vmem>>, vector<8x1x32xf32>,
    %c0_4 = arith.constant 0 : index
    %c0_5 = arith.constant 0 : index
    %4 = vector.load %arg2[%c0_4, %c0_5] : memref<8x32xf32, #tpu.memory_space<vmem>>, vector<8x32xf32>
    %c0_6 = arith.constant 0 : index
    %c1 = arith.constant 1 : index
    %c0_7 = arith.constant 0 : index
    %5 = vector.load %arg3[%c0_6, %c1, %c0_7] : memref<8x2x32xf32, #tpu.memory_space<vmem>>, vector<8x1x32xf32>
    %6 = vector.shape_cast %5 : vector<8x1x32xf32> to vector<8x32xf32>
    %7 = vector.shape_cast %4 : vector<8x32xf32> to vector<8x1x32xf32>
    tpu.vector_store %arg3[%c0_6, %c1, %c0_7], %7 {strides = array<i32>} : memref<8x2x32xf32, #tpu.memory_space<vmem>>, vector<8x1x32xf32>,
    return
  }
  func.func @transform_0(%arg0: i32) -> (i32, i32) {
    %c0_i32 = arith.constant 0 : i32
    %c0_i32_0 = arith.constant 0 : i32
    return %arg0, %c0_i32 : i32, i32
  }
  func.func @transform_1(%arg0: i32) -> (i32, i32) {
    %c0_i32 = arith.constant 0 : i32
    %c0_i32_0 = arith.constant 0 : i32
    return %arg0, %c0_i32 : i32, i32
  }
  func.func @transform_2(%arg0: i32) -> (i32, i32, i32) {
    %c0_i32 = arith.constant 0 : i32
    %c0_i32_0 = arith.constant 0 : i32
    %c0_i32_1 = arith.constant 0 : i32
    return %arg0, %c0_i32, %c0_i32_0 : i32, i32, i32
  }
}

</mosaic_0001>

<bundles_post_ra>
// kernel: tpu_custom_call.1
= control target key start
LH: loop header
LB: loop body
LE: loop exit
PB: predicated region body
PF: predicated region fallthrough
CT: control target
= control target key end

     0   :  { %7 = vsyncpa [#allocation3], 0  ;;  %s340_s0 = inlined_call_operand.hbm [shape: f32[8,32], index: 0, kind: input, shape index: {}]   ;;  %s341_s1 = inlined_call_operand.hbm [shape: f32[8,32], index: 1, kind: input, shape index: {}]   ;;  %s342_s2 = inlined_call_operand.hbm [shape: f32[8,2,32], index: 2, kind: output, shape index: {}]  }
   0x1   :  { %8 = vsyncpa [#allocation6], 0 }
   0x2   :  { %9 = vsyncpa [#allocation4], 0  ;;  %s267_s9 = smov [#allocation2]   ;;  %s268_s11 = smov [#allocation5]  }
   0x3   :  { %s16_s10 = sshll.u32 %s267_s9, 4  ;;  %s26_s12 = sshll.u32 %s268_s11, 4  ;;  %s17_s10 = int_to_ptr.vmem [resolvable:$true] %s16_s10  ;;  %s27_s12 = int_to_ptr.vmem [resolvable:$true] %s26_s12 }
   0x4   :  { %s195_s15 = scalar_lea.hbm %s340_s0, 128 }
   0x5   :  { %p196_p0 = scmp.ne.s32.totalorder %s340_s0, %s195_s15  ;;  %p199_p1 = scmp.lt.u32.totalorder %s195_s15, %s340_s0 }
   0x7   :  { %p201_p2 = pnand %p199_p1, %p196_p0 }
   0x9   :  { %204 = shalt.err (!%p201_p2)
}
   0xa   :  { %s205_s20 = scalar_lea.vmem %s17_s10, 128  ;;  %p210_p4 = scmp.lt.s32.totalorder %s17_s10, %s17_s10 }
   0xb   :  { %p206_p3 = scmp.ne.s32.totalorder %s17_s10, %s205_s20  ;;  %p211_p5 = scmp.lt.s32.totalorder %s205_s20, %s205_s20 }
   0xd   :  { %p212_p6 = por %p211_p5, %p210_p4 }
   0xf   :  { %p213_p7 = pnand %p212_p6, %p206_p3 }
  0x11   :  { %216 = shalt.err (!%p213_p7)
}
  0x12   :  { %19 = dma.hbm_to_vmem [thread:$0]  %s340_s0, 128, %s17_s10, [#allocation3]  }
  0x13   :  { %s217_s25 = scalar_lea.hbm %s341_s1, 128 }
  0x14   :  { %p218_p8 = scmp.ne.s32.totalorder %s341_s1, %s217_s25  ;;  %p221_p9 = scmp.lt.u32.totalorder %s217_s25, %s341_s1 }
  0x16   :  { %p223_p10 = pnand %p221_p9, %p218_p8 }
  0x18   :  { %226 = shalt.err (!%p223_p10)
}
  0x19   :  { %s227_s30 = scalar_lea.vmem %s27_s12, 128  ;;  %p232_p12 = scmp.lt.s32.totalorder %s27_s12, %s27_s12 }
  0x1a   :  { %p228_p11 = scmp.ne.s32.totalorder %s27_s12, %s227_s30  ;;  %p233_p13 = scmp.lt.s32.totalorder %s227_s30, %s227_s30 }
  0x1c   :  { %p234_p0 = por %p233_p13, %p232_p12 }
  0x1e   :  { %p235_p1 = pnand %p234_p0, %p228_p11 }
  0x20   :  { %238 = shalt.err (!%p235_p1)
}
  0x21   :  { %29 = dma.hbm_to_vmem [thread:$0]  %s341_s1, 128, %s27_s12, [#allocation6]  }
  0x22   :  { %261 = dma.done.wait [#allocation3], 128  }
  0x23   :  { %262 = vsyncadd [#allocation3], 4294967168 }
  0x24   :  { %263 = dma.done.wait [#allocation6], 128  }
  0x25   :  { %264 = vsyncadd [#allocation6], 4294967168  ;;  %v42_v0 = vlaneseq  ;;  %v269_v1 = vmov 1966171168   ;;  %v36_v6 = vld [vmem:[#allocation2] sm:$0xff]  ;;  %v104_v7 = vld [vmem:[#allocation5] sm:$0xff] }
  0x26   :  { %v40_v2 = vunpack.c.l.s4 %v269_v1  ;;  %v38_v9 = vcombine.high %v36_v6, %v36_v6  ;;  %v106_v11 = vcombine.high %v104_v7, %v104_v7  ;;  %vm95_vm0 = vcmask 253952   ;;  %s270_s1 = smov [#allocation7]  }
  0x27   :  { %v43_v3 = vshrl.u32 %v42_v0, 7  ;;  %s176_s4 = sshll.u32 %s270_s1, 4  ;;  %s177_s4 = int_to_ptr.vmem [resolvable:$true] %s176_s4 }
  0x28   :  { %v41_v4 = vunpack.c.0.s8 %v40_v2  ;;  %s239_s5 = scalar_lea.vmem %s177_s4, 256  ;;  %p244_p3 = scmp.lt.s32.totalorder %s177_s4, %s177_s4 }
  0x29   :  { %p240_p2 = scmp.ne.s32.totalorder %s177_s4, %s239_s5  ;;  %p245_p4 = scmp.lt.s32.totalorder %s239_s5, %s239_s5 }
  0x2a   :  { %v44_v5 = vsub.s32 %v41_v4, %v43_v3 }
  0x2b   :  { %p246_p5 = por %p245_p4, %p244_p3 }
  0x2c   :  { %v45_v8 = vrot.slane %v36_v6, %v44_v5  ;;  %v113_v10 = vrot.slane %v104_v7, %v44_v5  ;;  %v52_v14 = vrot.slane %v38_v9, %v44_v5  ;;  %v120_v17 = vrot.slane %v106_v11, %v44_v5 }
  0x2d   :  { %p247_p6 = pnand %p246_p5, %p240_p2 }
  0x2e   :  { %v61_v12 = vrot.slane %v45_v8, %v44_v5  ;;  %v53_v13 = vcombine.high %v45_v8, %v45_v8  ;;  %v129_v15 = vrot.slane %v113_v10, %v44_v5  ;;  %v121_v16 = vcombine.high %v113_v10, %v113_v10 }
  0x2f   :  { %v68_v20 = vrot.slane %v52_v14, %v44_v5  ;;  %v54_v21 = vcombine.high %v52_v14, %v52_v14  ;;  %v136_v24 = vrot.slane %v120_v17, %v44_v5  ;;  %v122_v25 = vcombine.high %v120_v17, %v120_v17 }
  0x30   :  { %96 = vst.msk [vmem:[#allocation7] sm:$0x1] %vm95_vm0, %v61_v12  ;;  %v75_v18 = vrot.slane %v53_v13, %v44_v5  ;;  %v83_v19 = vcombine.high %v61_v12, %v61_v12  ;;  %163 = vst.msk [vmem:[#allocation7 + $0x1] sm:$0x1] %vm95_vm0, %v129_v15  ;;  %v143_v22 = vrot.slane %v121_v16, %v44_v5 }
  0x31   :  { %v151_v23 = vcombine.high %v129_v15, %v129_v15  ;;  %100 = vst.msk [vmem:[#allocation7 + $0x8] sm:$0x1] %vm95_vm0, %v68_v20  ;;  %v82_v27 = vrot.slane %v54_v21, %v44_v5  ;;  %v84_v28 = vcombine.high %v68_v20, %v68_v20  ;;  %167 = vst.msk [vmem:[#allocation7 + $0x9] sm:$0x1] %vm95_vm0, %v136_v24 }
  0x32   :  { %97 = vst.msk [vmem:[#allocation7 + $0x2] sm:$0x1] %vm95_vm0, %v75_v18  ;;  %98 = vst.msk [vmem:[#allocation7 + $0x4] sm:$0x1] %vm95_vm0, %v83_v19  ;;  %v85_v26 = vcombine.high %v75_v18, %v75_v18  ;;  %v153_v29 = vcombine.high %v143_v22, %v143_v22  ;;  %v150_v30 = vrot.slane %v122_v25, %v44_v5 }
  0x33   :  { %164 = vst.msk [vmem:[#allocation7 + $0x3] sm:$0x1] %vm95_vm0, %v143_v22  ;;  %165 = vst.msk [vmem:[#allocation7 + $0x5] sm:$0x1] %vm95_vm0, %v151_v23  ;;  %v152_v31 = vcombine.high %v136_v24, %v136_v24  ;;  %v86_v32 = vcombine.high %v82_v27, %v82_v27 }
  0x34   :  { %99 = vst.msk [vmem:[#allocation7 + $0x6] sm:$0x1] %vm95_vm0, %v85_v26  ;;  %101 = vst.msk [vmem:[#allocation7 + $0xa] sm:$0x1] %vm95_vm0, %v82_v27  ;;  %v154_v33 = vcombine.high %v150_v30, %v150_v30 }
  0x35   :  { %102 = vst.msk [vmem:[#allocation7 + $0xc] sm:$0x1] %vm95_vm0, %v84_v28  ;;  %166 = vst.msk [vmem:[#allocation7 + $0x7] sm:$0x1] %vm95_vm0, %v153_v29 }
  0x36   :  { %168 = vst.msk [vmem:[#allocation7 + $0xb] sm:$0x1] %vm95_vm0, %v150_v30  ;;  %169 = vst.msk [vmem:[#allocation7 + $0xd] sm:$0x1] %vm95_vm0, %v152_v31 }
  0x37   :  { %103 = vst.msk [vmem:[#allocation7 + $0xe] sm:$0x1] %vm95_vm0, %v86_v32  ;;  %170 = vst.msk [vmem:[#allocation7 + $0xf] sm:$0x1] %vm95_vm0, %v154_v33 }
  0x38   :  { %250 = shalt.err (!%p247_p6)
}
  0x39   :  { %s251_s8 = scalar_lea.hbm %s342_s2, 256 }
  0x3a   :  { %p252_p7 = scmp.ne.s32.totalorder %s342_s2, %s251_s8  ;;  %p255_p8 = scmp.lt.u32.totalorder %s251_s8, %s342_s2 }
  0x3c   :  { %p257_p9 = pnand %p255_p8, %p252_p7 }
  0x3e   :  { %260 = shalt.err (!%p257_p9)
}
  0x3f   :  { %s271_s13 = smov 32   ;;  %s272_s14 = smov 2  }
  0x40   :  { %182 = dma.vmem_to_hbm [thread:$0]  %s177_s4, 256, %s342_s2, [#allocation4], %s271_s13, %s271_s13, %s272_s14  }
  0x41   :  { %265 = dma.done.wait [#allocation4], 256  }
  0x42   :  { %266 = vsyncadd [#allocation4], 4294967040 }
  0x43   :  { %186 = vsyncpa [#allocation3], 1 }
  0x44   :  { %187 = vsyncpa [#allocation6], 1 }
  0x45   :  { %188 = vsyncpa [#allocation4], 1 }

</bundles_post_ra>
